<compile_context>
chip_gen: v6e
topology: v6e:2x2x1
jax: 0.10.0
libtpu: 0.0.40
codegen_flags: <defaults>
</compile_context>

<pallas_src>
import jax
import jax.numpy as jnp
from jax.experimental import pallas as pl
from jax.experimental.pallas import tpu as pltpu

_LANES = 128
_ROW_ALIGN = 32          # sublane-safe tile rows for f32 (8), bf16 (16), int8/fp8 (32)
_MAX_TILE_ROWS = 8192    # 8192 * 128 * 4 B = 4 MiB per f32 block

_HAS_STATEFUL_NORMAL = hasattr(pltpu, "stateful_normal")


def _box_muller(shape):
    """Two N(0,1) outputs per (u1, u2) pair: half the PRNG / EUP work."""
    rows, lanes = shape
    half = (rows + 1) // 2
    b1 = pltpu.prng_random_bits((half, lanes))
    b2 = pltpu.prng_random_bits((half, lanes))
    # astype is a no-op if the bits are already uint32; value-preserving wrap
    # (i.e. bit-preserving) on older versions that return int32.
    b1 = b1.astype(jnp.uint32)
    b2 = b2.astype(jnp.uint32)
    u1 = ((b1 >> 8).astype(jnp.float32) + 1.0) * (1.0 / 16777216.0)  # (0, 1]
    u2 = (b2 >> 8).astype(jnp.float32) * (1.0 / 16777216.0)          # [0, 1)
    r = jnp.sqrt(-2.0 * jnp.log(u1))
    theta = (2.0 * jnp.pi) * u2
    n = jnp.concatenate([r * jnp.cos(theta), r * jnp.sin(theta)], axis=0)
    return n[:rows] if 2 * half != rows else n


def _gaussian_noise_tpu_kernel(seed_ref, x_ref, o_ref):
    # Independent, deterministic stream per grid block (and per base seed).
    pltpu.prng_seed(seed_ref[0], pl.program_id(0))
    shape = x_ref.shape
    if _HAS_STATEFUL_NORMAL:
        noise = pltpu.stateful_normal(shape, jnp.float32)
    else:
        noise = _box_muller(shape)
    # TODO(synk): on v6e/v7x a bf16-native noise path would halve vreg traffic
    # for bf16 inputs; kept f32 here so the same kernel is correct on v5e.
    o_ref[...] = (x_ref[...].astype(jnp.float32) + noise).astype(o_ref.dtype)


def _add_noise_kernel(x_ref, n_ref, o_ref):
    # Non-TPU fallback: noise is generated in the wrapper and streamed in.
    o_ref[...] = (x_ref[...].astype(jnp.float32) + n_ref[...]).astype(o_ref.dtype)


def _pick_tile_rows(rows: int) -> int:
    if rows <= _ROW_ALIGN:
        return rows  # single block covering the full array (always legal)
    # Prefer >= 2 blocks so v7x megacore has work for both TensorCores.
    target = min(_MAX_TILE_ROWS, pl.cdiv(rows, 2))
    return max(_ROW_ALIGN, (target // _ROW_ALIGN) * _ROW_ALIGN)


def gaussian_noise(x, seed, *, training=True):
    """GaussianNoiseLayer.forward.  x: any shape / float dtype.  seed: int."""
    if not training:
        return x  # eval mode: identity, no kernel launch

    orig_shape = x.shape
    total = int(x.size)
    if total == 0:
        return x

    # Lane-dense 2D layout: (rows, 128).  Pad only when total % 128 != 0
    # (then by < 128 elements); no rounding up to tile multiples.
    rows = pl.cdiv(total, _LANES)
    pad = rows * _LANES - total
    flat = x.reshape(-1)
    if pad:
        flat = jnp.pad(flat, (0, pad))
    x2 = flat.reshape(rows, _LANES)

    tile_rows = _pick_tile_rows(rows)
    grid = (pl.cdiv(rows, tile_rows),)

    if jax.default_backend() == "tpu":
        seed_arr = jnp.asarray([seed], dtype=jnp.int32)
        out2 = pl.pallas_call(
            _gaussian_noise_tpu_kernel,
            out_shape=jax.ShapeDtypeStruct((rows, _LANES), x.dtype),
            grid_spec=pltpu.PrefetchScalarGridSpec(
                num_scalar_prefetch=1,  # seed lands in SMEM
                grid=grid,
                in_specs=[pl.BlockSpec((tile_rows, _LANES), lambda i, s: (i, 0))],
                out_specs=pl.BlockSpec((tile_rows, _LANES), lambda i, s: (i, 0)),
            ),
            compiler_params=pltpu.CompilerParams(
                dimension_semantics=("parallel",),
                vmem_limit_bytes=32 * 1024 * 1024),
        )(seed_arr, x2)
    else:
        # Non-TPU backend (e.g. CPU interpreter): the TPU hardware PRNG has no
        # lowering there, so generate the noise with jax.random and add it in
        # a plain Pallas kernel with the same tiling.
        noise2 = jax.random.normal(jax.random.PRNGKey(seed), (rows, _LANES),
                                   dtype=jnp.float32)
        out2 = pl.pallas_call(
            _add_noise_kernel,
            out_shape=jax.ShapeDtypeStruct((rows, _LANES), x.dtype),
            grid=grid,
            in_specs=[pl.BlockSpec((tile_rows, _LANES), lambda i: (i, 0)),
                      pl.BlockSpec((tile_rows, _LANES), lambda i: (i, 0))],
            out_specs=pl.BlockSpec((tile_rows, _LANES), lambda i: (i, 0)),
        )(x2, noise2)

    if pad:
        out2 = out2.reshape(-1)[:total]
    return out2.reshape(orig_shape)


if __name__ == "__main__":
    # Small shapes consistent with the module's forward (element-wise op).
    N, C, H, W = 2, 4, 16, 16
    key = jax.random.PRNGKey(0)
    x = jax.random.normal(key, (N, C, H, W), dtype=jnp.float32)

    # TODO(synk): torch.randn cannot be reproduced bit-for-bit; the noise is
    # distributionally N(0, 1) instead.
    out = jax.block_until_ready(gaussian_noise(x, seed=1234, training=True))
    assert out.shape == x.shape and out.dtype == x.dtype

    # Eval mode is the identity (module semantics).
    out_eval = gaussian_noise(x, seed=1234, training=False)
    assert jnp.array_equal(out_eval, x)

    # Training mode adds unit-Gaussian noise: check statistics of (out - x).
    noise = (out - x).reshape(-1)
    m = float(jnp.mean(noise))
    s = float(jnp.std(noise))
    assert abs(m) < 0.15, f"noise mean off: {m}"
    assert 0.8 < s < 1.2, f"noise std off: {s}"

    # Deterministic per seed, different across seeds.
    out_again = jax.block_until_ready(gaussian_noise(x, seed=1234, training=True))
    assert jnp.array_equal(out, out_again)
    out_other = jax.block_until_ready(gaussian_noise(x, seed=999, training=True))
    assert not jnp.array_equal(out, out_other)

    print("KERNEL_OK")
</pallas_src>

<mosaic_0001>
module attributes {stable_mosaic.version = 11 : i64} {
  func.func @_add_noise_kernel(%arg0: i32, %arg1: memref<16x128xf32, #tpu.memory_space<vmem>>, %arg2: memref<16x128xf32, #tpu.memory_space<vmem>>, %arg3: memref<16x128xf32, #tpu.memory_space<vmem>>) attributes {dimension_semantics = [#tpu.dimension_semantics<arbitrary>], iteration_bounds = array<i64: 1>, scalar_prefetch = 0 : i64, scratch_operands = 0 : i64, tpu.core_type = #tpu.core_type<tc>, window_params = [{transform_indices = @transform_0, window_bounds = array<i64: 16, 128>}, {transform_indices = @transform_1, window_bounds = array<i64: 16, 128>}, {transform_indices = @transform_2, window_bounds = array<i64: 16, 128>}]} {
    %c0 = arith.constant 0 : index
    %c0_0 = arith.constant 0 : index
    %0 = vector.load %arg1[%c0, %c0_0] : memref<16x128xf32, #tpu.memory_space<vmem>>, vector<16x128xf32>
    %c0_1 = arith.constant 0 : index
    %c0_2 = arith.constant 0 : index
    %1 = vector.load %arg2[%c0_1, %c0_2] : memref<16x128xf32, #tpu.memory_space<vmem>>, vector<16x128xf32>
    %2 = arith.addf %0, %1 : vector<16x128xf32>
    %c0_3 = arith.constant 0 : index
    %c0_4 = arith.constant 0 : index
    %3 = vector.load %arg3[%c0_3, %c0_4] : memref<16x128xf32, #tpu.memory_space<vmem>>, vector<16x128xf32>
    tpu.vector_store %arg3[%c0_3, %c0_4], %2 {strides = array<i32>} : memref<16x128xf32, #tpu.memory_space<vmem>>, vector<16x128xf32>,
    return
  }
  func.func @transform_0(%arg0: i32) -> (i32, i32) {
    %c0_i32 = arith.constant 0 : i32
    %c0_i32_0 = arith.constant 0 : i32
    return %arg0, %c0_i32 : i32, i32
  }
  func.func @transform_1(%arg0: i32) -> (i32, i32) {
    %c0_i32 = arith.constant 0 : i32
    %c0_i32_0 = arith.constant 0 : i32
    return %arg0, %c0_i32 : i32, i32
  }
  func.func @transform_2(%arg0: i32) -> (i32, i32) {
    %c0_i32 = arith.constant 0 : i32
    %c0_i32_0 = arith.constant 0 : i32
    return %arg0, %c0_i32 : i32, i32
  }
}

</mosaic_0001>

<bundles_post_ra>
// kernel: tpu_custom_call.1
= control target key start
LH: loop header
LB: loop body
LE: loop exit
PB: predicated region body
PF: predicated region fallthrough
CT: control target
= control target key end

     0   :  { %7 = vsyncpa [#allocation3], 0  ;;  %s175_s0 = inlined_call_operand.hbm [shape: f32[16,128], index: 0, kind: input, shape index: {}]   ;;  %s176_s1 = inlined_call_operand.hbm [shape: f32[16,128], index: 1, kind: input, shape index: {}]   ;;  %s177_s2 = inlined_call_operand.hbm [shape: f32[16,128], index: 2, kind: output, shape index: {}]  }
   0x1   :  { %8 = vsyncpa [#allocation6], 0 }
   0x2   :  { %9 = vsyncpa [#allocation4], 0  ;;  %s137_s9 = smov [#allocation2]  }
   0x3   :  { %s15_s10 = sshll.u32 %s137_s9, 4  ;;  %s16_s10 = int_to_ptr.vmem [resolvable:$true] %s15_s10 }
   0x4   :  { %s79_s11 = scalar_lea.vmem %s16_s10, 256  ;;  %p84_p1 = scmp.lt.s32.totalorder %s16_s10, %s16_s10 }
   0x5   :  { %p80_p0 = scmp.ne.s32.totalorder %s16_s10, %s79_s11  ;;  %p85_p2 = scmp.lt.s32.totalorder %s79_s11, %s79_s11 }
   0x7   :  { %p86_p3 = por %p85_p2, %p84_p1 }
   0x9   :  { %p87_p4 = pnand %p86_p3, %p80_p0 }
   0xb   :  { %90 = shalt.err (!%p87_p4)
}
   0xc   :  { %s138_s12 = smov 128   ;;  %s139_s13 = smov 8  }
   0xd   :  { %21 = dma.hbm_to_vmem [thread:$0]  %s175_s0, 256, %s16_s10, [#allocation3], %s138_s12, %s138_s12, %s139_s13  }
   0xe   :  { %s140_s16 = smov [#allocation5]  }
   0xf   :  { %s27_s17 = sshll.u32 %s140_s16, 4  ;;  %s28_s17 = int_to_ptr.vmem [resolvable:$true] %s27_s17 }
  0x10   :  { %s99_s18 = scalar_lea.vmem %s28_s17, 256  ;;  %p104_p6 = scmp.lt.s32.totalorder %s28_s17, %s28_s17 }
  0x11   :  { %p100_p5 = scmp.ne.s32.totalorder %s28_s17, %s99_s18  ;;  %p105_p7 = scmp.lt.s32.totalorder %s99_s18, %s99_s18 }
  0x13   :  { %p106_p8 = por %p105_p7, %p104_p6 }
  0x15   :  { %p107_p9 = pnand %p106_p8, %p100_p5 }
  0x17   :  { %110 = shalt.err (!%p107_p9)
}
  0x18   :  { %33 = dma.hbm_to_vmem [thread:$0]  %s176_s1, 256, %s28_s17, [#allocation6], %s138_s12, %s138_s12, %s139_s13  }
  0x19   :  { %131 = dma.done.wait [#allocation3], 256  }
  0x1a   :  { %132 = vsyncadd [#allocation3], 4294967040 }
  0x1b   :  { %133 = dma.done.wait [#allocation6], 256  }
  0x1c   :  { %134 = vsyncadd [#allocation6], 4294967040  ;;  %s141_s0 = smov [#allocation7]   ;;  %v40_v0 = vld [vmem:[#allocation2] sm:$0xff]  ;;  %v42_v1 = vld [vmem:[#allocation5] sm:$0xff] }
  0x1d   :  { %s53_s21 = sshll.u32 %s141_s0, 4  ;;  %v41_v2 = vld [vmem:[#allocation2 + $0x8] sm:$0xff]  ;;  %v44_v3 = vadd.f32 %v42_v1, %v40_v0  ;;  %v43_v4 = vld [vmem:[#allocation5 + $0x8] sm:$0xff]  ;;  %s54_s21 = int_to_ptr.vmem [resolvable:$true] %s53_s21 }
  0x1e   :  { %v45_v5 = vadd.f32 %v43_v4, %v41_v2  ;;  %s111_s22 = scalar_lea.vmem %s54_s21, 256  ;;  %p116_p11 = scmp.lt.s32.totalorder %s54_s21, %s54_s21 }
  0x1f   :  { %46 = vst [vmem:[#allocation7] sm:$0xff] %v44_v3  ;;  %p112_p10 = scmp.ne.s32.totalorder %s54_s21, %s111_s22  ;;  %p117_p12 = scmp.lt.s32.totalorder %s111_s22, %s111_s22 }
  0x20   :  { %47 = vst [vmem:[#allocation7 + $0x8] sm:$0xff] %v45_v5 }
  0x21   :  { %p118_p13 = por %p117_p12, %p116_p11 }
  0x23   :  { %p119_p0 = pnand %p118_p13, %p112_p10 }
  0x25   :  { %122 = shalt.err (!%p119_p0)
}
  0x26   :  { %59 = dma.vmem_to_hbm [thread:$0]  %s54_s21, 256, %s177_s2, [#allocation4], %s138_s12, %s138_s12, %s139_s13  }
  0x27   :  { %135 = dma.done.wait [#allocation4], 256  }
  0x28   :  { %136 = vsyncadd [#allocation4], 4294967040 }
  0x29   :  { %63 = vsyncpa [#allocation3], 1 }
  0x2a   :  { %64 = vsyncpa [#allocation6], 1 }
  0x2b   :  { %65 = vsyncpa [#allocation4], 1 }

</bundles_post_ra>
